<compile_context>
chip_gen: v6e
topology: v6e:2x2x1
jax: 0.10.0
libtpu: 0.0.40
codegen_flags: <defaults>
</compile_context>

<pallas_src>
import functools

import jax
import jax.numpy as jnp
from jax.experimental import pallas as pl
from jax.experimental.pallas import tpu as pltpu


def _mlp_kernel(x_ref, *rest):
    """One packed row tile through the whole MLP.

    rest = (w0_ref, ..., w{L-1}_ref, o_ref); each w_ref is the block-diagonal
    packed [P*in, P*out] weight (bf16).  Matmul chain on the MXU (bf16 inputs,
    f32 accumulation) with ReLU (VPU) between layers, none after the last.
    """
    *w_refs, o_ref = rest
    h = x_ref[...]                                   # (TM, P*d_in)
    last = len(w_refs) - 1
    for l, w_ref in enumerate(w_refs):
        h = jnp.dot(h.astype(w_ref.dtype), w_ref[...],
                    preferred_element_type=jnp.float32)
        if l != last:
            h = jnp.maximum(h, 0.0)                  # ReLU between layers
    o_ref[...] = h.astype(o_ref.dtype)


def _default_pack(dims):
    """Generation-aware lane-packing factor (128-lane target on v5, else 256)."""
    try:
        kind = jax.devices()[0].device_kind.lower()
    except Exception:  # pragma: no cover - no devices / odd backend
        kind = ""
    lane_target = 128 if "v5" in kind else 256
    return max(1, min(8, lane_target // max(dims)))


def pack_mlp_weights(weights, pack, dtype=jnp.bfloat16):
    """Block-diagonal diag(W^T,...,W^T) packed weights, cast for the MXU.

    Call this once per parameter set (outside any per-step jit) and reuse.
    """
    eye = jnp.eye(pack, dtype=jnp.float32)
    return [jnp.kron(eye, jnp.asarray(w, jnp.float32).T).astype(dtype)
            for w in weights]


@functools.partial(jax.jit, static_argnames=("pack", "tm"))
def mlp_forward_packed(x, w_packed, *, pack, tm=4096):
    """x: [N, d_in]; w_packed: list of [P*in, P*out] block-diag weights."""
    n, d_in = x.shape
    P = int(pack)
    d_out = w_packed[-1].shape[1] // P
    assert w_packed[0].shape[0] == P * d_in

    # Pad rows only to a multiple of P (needed for the packing reshape); the
    # ragged row-tile boundary is handled by Pallas partial blocks, not padding.
    n_padp = -(-n // P) * P
    if n_padp != n:
        x = jnp.pad(x, ((0, n_padp - n), (0, 0)))
    rows = n_padp // P
    x_packed = x.reshape(rows, P * d_in)             # free contiguous reshape

    # Row tiling over packed rows.
    tm_p = min(int(tm), rows)
    if rows >= 16:
        tm_p = min(tm_p, -(-rows // 2))              # grid_m >= 2 -> both TCs busy
    tm_p = ((tm_p + 7) // 8) * 8                     # sublane multiple
    grid_m = pl.cdiv(rows, tm_p)

    in_specs = [pl.BlockSpec((tm_p, P * d_in), lambda i: (i, 0))]
    # Grid-invariant weights: full-array blocks, resident across the grid.
    in_specs += [pl.BlockSpec(w.shape, lambda i: (0, 0)) for w in w_packed]

    # Advisory cost estimate (actual packed flops; HBM activation + weight bytes).
    flops = 0
    prev = P * d_in
    for w in w_packed:
        flops += 2 * rows * prev * int(w.shape[1])
        prev = int(w.shape[1])
    bytes_accessed = (x_packed.size * x_packed.dtype.itemsize
                      + rows * P * d_out * x_packed.dtype.itemsize
                      + sum(w.size * w.dtype.itemsize for w in w_packed))

    out_packed = pl.pallas_call(
        _mlp_kernel,
        out_shape=jax.ShapeDtypeStruct((rows, P * d_out), x.dtype),
        grid_spec=pltpu.PrefetchScalarGridSpec(
            num_scalar_prefetch=0,
            grid=(grid_m,),
            in_specs=in_specs,
            out_specs=pl.BlockSpec((tm_p, P * d_out), lambda i: (i, 0)),
        ),
        compiler_params=pltpu.CompilerParams(
            dimension_semantics=("parallel",),       # shard rows across TCs
            vmem_limit_bytes=48 << 20),
        cost_estimate=pl.CostEstimate(
            flops=flops, transcendentals=0, bytes_accessed=bytes_accessed),
    )(x_packed, *w_packed)

    out = out_packed.reshape(n_padp, d_out)
    if n_padp != n:
        out = out[:n]
    return out


def mlp_forward(x, weights, *, tm=4096, pack=None,
                mxu_dtype=jnp.bfloat16, bf16_io=False):
    """Convenience wrapper: x [N, d_in] f32; weights torch-layout [out, in]."""
    dims = [int(x.shape[1])] + [int(w.shape[0]) for w in weights]
    if pack is None:
        pack = _default_pack(dims)
    w_packed = pack_mlp_weights(weights, int(pack), dtype=mxu_dtype)
    if bf16_io:
        x = x.astype(jnp.bfloat16)                   # optional: halves HBM I/O
    return mlp_forward_packed(x, w_packed, pack=int(pack), tm=int(tm))


def init_mlp_params(key, dim_in, dim_out, dim_hidden, num_layers):
    """Deterministic init matching the module's Linear(bias=False) shapes."""
    dims = [dim_in] + [dim_hidden] * (num_layers - 1) + [dim_out]
    ks = jax.random.split(key, num_layers)
    weights = []
    for l in range(num_layers):
        fan_in = dims[l]
        bound = 1.0 / (fan_in ** 0.5)   # ~ torch default kaiming_uniform scale
        weights.append(jax.random.uniform(
            ks[l], (dims[l + 1], dims[l]), minval=-bound, maxval=bound,
            dtype=jnp.float32))
    return weights


def mlp_reference(x, weights):
    """Pure-JAX f32 reference mirroring the PyTorch forward."""
    h = x
    for l, w in enumerate(weights):
        h = h @ w.T
        if l != len(weights) - 1:
            h = jax.nn.relu(h)
    return h


if __name__ == "__main__":
    # Small shapes consistent with the nerf_triplane MLPs; N deliberately not a
    # multiple of the tile size to exercise the partial-block path.
    N, DIM_IN, DIM_HIDDEN, DIM_OUT, NUM_LAYERS = 200, 32, 64, 16, 3

    key = jax.random.PRNGKey(0)
    kx, kp = jax.random.split(key)
    x = jax.random.normal(kx, (N, DIM_IN), dtype=jnp.float32)
    weights = init_mlp_params(kp, DIM_IN, DIM_OUT, DIM_HIDDEN, NUM_LAYERS)

    out = mlp_forward(x, weights)
    out = jax.block_until_ready(out)

    ref = mlp_reference(x, weights)
    assert out.shape == (N, DIM_OUT) and out.dtype == jnp.float32
    # bf16 MXU inputs (f32 accumulation) -> loosened tolerance vs the f32 ref.
    assert jnp.allclose(out, ref, atol=5e-2, rtol=5e-2), \
        float(jnp.max(jnp.abs(out - ref)))

    print("KERNEL_OK")
</pallas_src>

<mosaic_0001>
module attributes {stable_mosaic.version = 11 : i64} {
  func.func @_mlp_kernel(%arg0: i32, %arg1: memref<32x128xf32, #tpu.memory_space<vmem>>, %arg2: memref<128x256xbf16, #tpu.memory_space<vmem>>, %arg3: memref<256x256xbf16, #tpu.memory_space<vmem>>, %arg4: memref<256x64xbf16, #tpu.memory_space<vmem>>, %arg5: memref<32x64xf32, #tpu.memory_space<vmem>>) attributes {dimension_semantics = [#tpu.dimension_semantics<parallel>], iteration_bounds = array<i64: 2>, scalar_prefetch = 0 : i64, scratch_operands = 0 : i64, tpu.core_type = #tpu.core_type<tc>, window_params = [{transform_indices = @transform_0, window_bounds = array<i64: 32, 128>}, {pipeline_mode = #tpu.pipeline_mode<synchronous>, transform_indices = @transform_1, window_bounds = array<i64: 128, 256>}, {pipeline_mode = #tpu.pipeline_mode<synchronous>, transform_indices = @transform_2, window_bounds = array<i64: 256, 256>}, {pipeline_mode = #tpu.pipeline_mode<synchronous>, transform_indices = @transform_3, window_bounds = array<i64: 256, 64>}, {transform_indices = @transform_4, window_bounds = array<i64: 32, 64>}]} {
    %c0 = arith.constant 0 : index
    %c0_0 = arith.constant 0 : index
    %0 = vector.load %arg1[%c0, %c0_0] : memref<32x128xf32, #tpu.memory_space<vmem>>, vector<32x128xf32>
    %1 = arith.truncf %0 : vector<32x128xf32> to vector<32x128xbf16>
    %c0_1 = arith.constant 0 : index
    %c0_2 = arith.constant 0 : index
    %2 = vector.load %arg2[%c0_1, %c0_2] : memref<128x256xbf16, #tpu.memory_space<vmem>>, vector<128x256xbf16>
    %cst = arith.constant dense<0.000000e+00> : vector<32x256xf32>
    %3 = tpu.matmul %1, %2, %cst {dimension_numbers = #tpu.dot_dimension_numbers<[1], [0], [0], [1], [0, 0, 1, 1], [], []>} : vector<32x128xbf16>, vector<128x256xbf16>, vector<32x256xf32> -> vector<32x256xf32>
    %cst_3 = arith.constant 0.000000e+00 : f32
    %4 = vector.broadcast %cst_3 : f32 to vector<32x256xf32>
    %5 = arith.maximumf %3, %4 : vector<32x256xf32>
    %6 = arith.truncf %5 : vector<32x256xf32> to vector<32x256xbf16>
    %c0_4 = arith.constant 0 : index
    %c0_5 = arith.constant 0 : index
    %7 = vector.load %arg3[%c0_4, %c0_5] : memref<256x256xbf16, #tpu.memory_space<vmem>>, vector<256x256xbf16>
    %cst_6 = arith.constant dense<0.000000e+00> : vector<32x256xf32>
    %8 = tpu.matmul %6, %7, %cst_6 {dimension_numbers = #tpu.dot_dimension_numbers<[1], [0], [0], [1], [0, 0, 1, 1], [], []>} : vector<32x256xbf16>, vector<256x256xbf16>, vector<32x256xf32> -> vector<32x256xf32>
    %cst_7 = arith.constant 0.000000e+00 : f32
    %9 = vector.broadcast %cst_7 : f32 to vector<32x256xf32>
    %10 = arith.maximumf %8, %9 : vector<32x256xf32>
    %11 = arith.truncf %10 : vector<32x256xf32> to vector<32x256xbf16>
    %c0_8 = arith.constant 0 : index
    %c0_9 = arith.constant 0 : index
    %12 = vector.load %arg4[%c0_8, %c0_9] : memref<256x64xbf16, #tpu.memory_space<vmem>>, vector<256x64xbf16>
    %cst_10 = arith.constant dense<0.000000e+00> : vector<32x64xf32>
    %13 = tpu.matmul %11, %12, %cst_10 {dimension_numbers = #tpu.dot_dimension_numbers<[1], [0], [0], [1], [0, 0, 1, 1], [], []>} : vector<32x256xbf16>, vector<256x64xbf16>, vector<32x64xf32> -> vector<32x64xf32>
    %c0_11 = arith.constant 0 : index
    %c0_12 = arith.constant 0 : index
    %14 = vector.load %arg5[%c0_11, %c0_12] : memref<32x64xf32, #tpu.memory_space<vmem>>, vector<32x64xf32>
    tpu.vector_store %arg5[%c0_11, %c0_12], %13 {strides = array<i32>} : memref<32x64xf32, #tpu.memory_space<vmem>>, vector<32x64xf32>,
    return
  }
  func.func @transform_0(%arg0: i32) -> (i32, i32) {
    %c0_i32 = arith.constant 0 : i32
    %c0_i32_0 = arith.constant 0 : i32
    return %arg0, %c0_i32 : i32, i32
  }
  func.func @transform_1(%arg0: i32) -> (i32, i32) {
    %c0_i32 = arith.constant 0 : i32
    %c0_i32_0 = arith.constant 0 : i32
    %c0_i32_1 = arith.constant 0 : i32
    return %c0_i32, %c0_i32_0 : i32, i32
  }
  func.func @transform_2(%arg0: i32) -> (i32, i32) {
    %c0_i32 = arith.constant 0 : i32
    %c0_i32_0 = arith.constant 0 : i32
    %c0_i32_1 = arith.constant 0 : i32
    return %c0_i32, %c0_i32_0 : i32, i32
  }
  func.func @transform_3(%arg0: i32) -> (i32, i32) {
    %c0_i32 = arith.constant 0 : i32
    %c0_i32_0 = arith.constant 0 : i32
    %c0_i32_1 = arith.constant 0 : i32
    return %c0_i32, %c0_i32_0 : i32, i32
  }
  func.func @transform_4(%arg0: i32) -> (i32, i32) {
    %c0_i32 = arith.constant 0 : i32
    %c0_i32_0 = arith.constant 0 : i32
    return %arg0, %c0_i32 : i32, i32
  }
}

</mosaic_0001>

<bundles_post_ra>
// kernel: mlp_forward_packed.1
= control target key start
LH: loop header
LB: loop body
LE: loop exit
PB: predicated region body
PF: predicated region fallthrough
CT: control target
= control target key end

     0   :  { %s1464_s15 = smov 0   ;;  %s1466_s16 = smov 0   ;;  %s1758_s0 = inlined_call_operand.vmem [shape: f32[50,128], index: 0, kind: input, shape index: {}]   ;;  %s1759_s1 = inlined_call_operand.vmem [shape: bf16[128,256], index: 1, kind: input, shape index: {}]   ;;  %s1760_s2 = inlined_call_operand.vmem [shape: bf16[256,256], index: 2, kind: input, shape index: {}]   ;;  %s1761_s3 = inlined_call_operand.vmem [shape: bf16[256,64], index: 3, kind: input, shape index: {}]   ;;  %s1762_s4 = inlined_call_operand.vmem [shape: f32[50,64], index: 4, kind: output, shape index: {}]  }
   0x1   :  { %s1468_s17 = smov 0  }
   0x2 LB: > { %s1477_s18 = sadd.s32 4294967295, %s1404_s17   ;;  %s1479_s19 = sadd.s32 1, %s1404_s17   ;;  %s1404_s17 = sphi %s1468_s17, %s1769_s17   ;;  %s1400_s16 = sphi %s1466_s16, %s1768_s16   ;;  %s1396_s15 = sphi %s1464_s15, %s1767_s15  }
   0x3   : > { %s107_s20 = ssub.s32 %s1404_s17, %s1479_s19  ;;  %s110_s21 = sadd.s32 1, %s1400_s16 }
   0x4   : > { %p108_p0 = scmp.eq.s32.totalorder %s107_s20, 0  ;;  %p120_p1 = scmp.ne.s32.totalorder %s1400_s16, %s1396_s15 }
   0x5   : > { %p121_p2 = scmp.eq.s32.totalorder %s1477_s18, 1  ;;  %p1057_p3 = scmp.ge.s32.totalorder %s1404_s17, 1 }
   0x6   : > { %s1487_s22 = scalar_select %p108_p0, %s1400_s16, %s110_s21  }
   0x7   : > { %p1489_p4 = por %p121_p2, %p120_p1  ;;  %p171_p5 = scmp.lt.s32.totalorder %s1404_s17, 3 }
   0x9   : > { %p172_p6 = pnand %p1057_p3, %p171_p5 }
   0xa   : > { %s1516_s12 = sshll.u32 (!%p172_p6), %s1477_s18, 2  ;;  %s197_s24 = sand.u32 (!%p172_p6), 1, %s1396_s15  }
   0xb   : > { %175 = sbr.rel (%p172_p6) target bundleno = 706 (0x2c2), region = 36  ;;  %p205_p7 = scmp.lt.s32.totalorder (!%p172_p6), %s1516_s12, 6 }
  0x10   : > { %v1262_v0 = vld [vmem:[%s1759_s1 + $0x74] ss:$8 sps:$4 sm:$0xff]   ;;  %v1264_v1 = vld [vmem:[%s1759_s1 + $0x70] ss:$8 sps:$4 sm:$0xff]   ;;  %v1438_v2 = vmov 0   ;;  %s206_s9 = scalar_select %p205_p7, %s1516_s12, 6 }
  0x11   : > { %354 = vmatprep.mubr.bf16.mxu0 %v1438_v2  ;;  %322 = vmatprep.subr.bf16.mxu0 %v1262_v0  ;;  %v1265_v3 = vld [vmem:[%s1759_s1 + $0x64] ss:$8 sps:$4 sm:$0xff]   ;;  %v1267_v4 = vld [vmem:[%s1759_s1 + $0x60] ss:$8 sps:$4 sm:$0xff]   ;;  %v1268_v5 = vld [vmem:[%s1759_s1 + $0x54] ss:$8 sps:$4 sm:$0xff]  }
  0x12   : > { %323 = vmatpush1.bf16.msra.mxu0 %v1264_v1  ;;  %v1270_v6 = vld [vmem:[%s1759_s1 + $0x50] ss:$8 sps:$4 sm:$0xff]   ;;  %v1271_v7 = vld [vmem:[%s1759_s1 + $0x44] ss:$8 sps:$4 sm:$0xff]   ;;  %v1273_v8 = vld [vmem:[%s1759_s1 + $0x40] ss:$8 sps:$4 sm:$0xff]  }
  0x13   : > { %324 = vmatprep.subr.bf16.mxu0 %v1265_v3  ;;  %v1274_v9 = vld [vmem:[%s1759_s1 + $0x34] ss:$8 sps:$4 sm:$0xff]   ;;  %v1288_v11 = vld [vmem:[%s1760_s2 + $0x70] ss:$8 sps:$4 sm:$0xff]   ;;  %v1289_v13 = vld [vmem:[%s1760_s2 + $0x64] ss:$8 sps:$4 sm:$0xff]  }
  0x14   : > { %v1286_v10 = vld [vmem:[%s1760_s2 + $0x74] ss:$8 sps:$4 sm:$0xff]   ;;  %v1276_v12 = vld [vmem:[%s1759_s1 + $0x30] ss:$8 sps:$4 sm:$0xff]   ;;  %v1277_v14 = vld [vmem:[%s1759_s1 + $0x24] ss:$8 sps:$4 sm:$0xff]  }
  0x15   : > { %579 = vmatprep.subr.bf16.mxu1 %v1286_v10  ;;  %v1291_v15 = vld [vmem:[%s1760_s2 + $0x60] ss:$8 sps:$4 sm:$0xff]   ;;  %v1292_v16 = vld [vmem:[%s1760_s2 + $0x54] ss:$8 sps:$4 sm:$0xff]   ;;  %v1294_v19 = vld [vmem:[%s1760_s2 + $0x50] ss:$8 sps:$4 sm:$0xff]  }
  0x16   : > { %325 = vmatpush1.bf16.msra.mxu0 %v1267_v4  ;;  %580 = vmatpush1.bf16.msra.mxu1 %v1288_v11  ;;  %v1279_v17 = vld [vmem:[%s1759_s1 + $0x20] ss:$8 sps:$4 sm:$0xff]   ;;  %v1280_v18 = vld [vmem:[%s1759_s1 + $0x14] ss:$8 sps:$4 sm:$0xff]   ;;  %s1060_s25 = sshll.u32 %s206_s9, 3  ;;  %vm821_vm0 = vcmask 523264  }
  0x17   : > { %326 = vmatprep.subr.bf16.mxu0 %v1268_v5  ;;  %581 = vmatprep.subr.bf16.mxu1 %v1289_v13  ;;  %v1295_v20 = vld [vmem:[%s1760_s2 + $0x44] ss:$8 sps:$4 sm:$0xff]   ;;  %v1282_v21 = vld [vmem:[%s1759_s1 + $0x10] ss:$8 sps:$4 sm:$0xff]   ;;  %s208_s8 = scalar_lea.vmem %s1758_s0, %s1060_s25  ;;  %v1297_v23 = vld [vmem:[%s1760_s2 + $0x40] ss:$8 sps:$4 sm:$0xff]  }
  0x18   : > { %v1283_v22 = vld [vmem:[%s1759_s1 + $0x4] ss:$8 sps:$4 sm:$0xff]   ;;  %v1298_v24 = vld [vmem:[%s1760_s2 + $0x34] ss:$8 sps:$4 sm:$0xff]   ;;  %v1285_v25 = vld [vmem:[%s1759_s1] ss:$8 sps:$4 sm:$0xff]  }
  0x19   : > { %v220_v26 = vld [vmem:[%s208_s8] sm:$0xff]  ;;  %v221_v27 = vld [vmem:[%s208_s8 + $0x8] sm:$0xff]  ;;  %v1300_v28 = vld [vmem:[%s1760_s2 + $0x30] ss:$8 sps:$4 sm:$0xff]   ;;  %s1058_s25 = sshll.u32 %s197_s24, 5  ;;  %s834_s15 = ssub.s32 (%p1489_p4), 7, %s1516_s12 }
  0x1a   : > { %327 = vmatpush1.bf16.msra.mxu0 %v1270_v6  ;;  %582 = vmatpush1.bf16.msra.mxu1 %v1291_v15  ;;  %v1301_v29 = vld [vmem:[%s1760_s2 + $0x24] ss:$8 sps:$4 sm:$0xff]   ;;  %v1303_v30 = vld [vmem:[%s1760_s2 + $0x20] ss:$8 sps:$4 sm:$0xff]   ;;  %v224_v31 = vpack.c.bf16 %v221_v27, %v220_v26  ;;  %v1304_v32 = vld [vmem:[%s1760_s2 + $0x14] ss:$8 sps:$4 sm:$0xff]  }
  0x1b   : > { %328 = vmatprep.subr.bf16.mxu0 %v1271_v7  ;;  %583 = vmatprep.subr.bf16.mxu1 %v1292_v16  ;;  %v222_v33 = vld [vmem:[%s208_s8 + $0x10] sm:$0xff]  ;;  %v223_v34 = vld [vmem:[%s208_s8 + $0x18] sm:$0xff]  ;;  %v1307_v36 = vld [vmem:[%s1760_s2 + $0x4] ss:$8 sps:$4 sm:$0xff]   ;;  %s1696_s26 = scalar_lea.vmem [#allocation2], %s1058_s25   ;;  %s1142_s27 = sshll.u32 (%p1489_p4), %s1477_s18, 5 }
  0x1c   : > { %v1306_v35 = vld [vmem:[%s1760_s2 + $0x10] ss:$8 sps:$4 sm:$0xff]   ;;  %v1309_v37 = vld [vmem:[%s1760_s2] ss:$8 sps:$4 sm:$0xff]   ;;  %v225_v38 = vpack.c.bf16 %v223_v34, %v222_v33  ;;  %v1310_v39 = vld [vmem:[%s1760_s2 + $0xf4] ss:$8 sps:$4 sm:$0xff]   ;;  %s1709_s30 = scalar_lea.vmem (%p1489_p4), %s1762_s4, %s1142_s27  }
  0x1d   : > { %v1312_v40 = vld [vmem:[%s1760_s2 + $0xf0] ss:$8 sps:$4 sm:$0xff]   ;;  %v1313_v41 = vld [vmem:[%s1760_s2 + $0xe4] ss:$8 sps:$4 sm:$0xff]   ;;  %v1315_v42 = vld [vmem:[%s1760_s2 + $0xe0] ss:$8 sps:$4 sm:$0xff]  }
  0x1e   : > { %329 = vmatpush1.bf16.msra.mxu0 %v1273_v8  ;;  %584 = vmatpush1.bf16.msra.mxu1 %v1294_v19  ;;  %v1316_v43 = vld [vmem:[%s1760_s2 + $0xd4] ss:$8 sps:$4 sm:$0xff]   ;;  %v1318_v44 = vld [vmem:[%s1760_s2 + $0xd0] ss:$8 sps:$4 sm:$0xff]   ;;  %v1319_v45 = vld [vmem:[%s1760_s2 + $0xc4] ss:$8 sps:$4 sm:$0xff]  }
  0x1f   : > { %330 = vmatprep.subr.bf16.mxu0 %v1274_v9  ;;  %585 = vmatprep.subr.bf16.mxu1 %v1295_v20  ;;  %v1321_v46 = vld [vmem:[%s1760_s2 + $0xc0] ss:$8 sps:$4 sm:$0xff]   ;;  %v1322_v47 = vld [vmem:[%s1760_s2 + $0xb4] ss:$8 sps:$4 sm:$0xff]   ;;  %v1324_v48 = vld [vmem:[%s1760_s2 + $0xb0] ss:$8 sps:$4 sm:$0xff]  }
  0x20   : > { %v1325_v49 = vld [vmem:[%s1760_s2 + $0xa4] ss:$8 sps:$4 sm:$0xff]   ;;  %v1327_v50 = vld [vmem:[%s1760_s2 + $0xa0] ss:$8 sps:$4 sm:$0xff]   ;;  %v1328_v51 = vld [vmem:[%s1760_s2 + $0x94] ss:$8 sps:$4 sm:$0xff]  }
  0x21   : > { %v1330_v52 = vld [vmem:[%s1760_s2 + $0x90] ss:$8 sps:$4 sm:$0xff]   ;;  %v1331_v53 = vld [vmem:[%s1760_s2 + $0x84] ss:$8 sps:$4 sm:$0xff]   ;;  %v1333_v54 = vld [vmem:[%s1760_s2 + $0x80] ss:$8 sps:$4 sm:$0xff]  }
  0x22   : > { %331 = vmatpush1.bf16.msra.mxu0 %v1276_v12  ;;  %586 = vmatpush1.bf16.msra.mxu1 %v1297_v23  ;;  %v1334_v55 = vld [vmem:[%s1761_s3 + $0x78] sm:$0xff]   ;;  %v1336_v57 = vld [vmem:[%s1761_s3 + $0x70] sm:$0xff]   ;;  %v1338_v59 = vld [vmem:[%s1761_s3 + $0x68] sm:$0xff]   ;;  %p835_p8 = scmp.lt.s32.totalorder (%p1489_p4), %s834_s15, 4 }
  0x23   : > { %332 = vmatprep.subr.bf16.mxu0 %v1277_v14  ;;  %587 = vmatprep.subr.bf16.mxu1 %v1298_v24  ;;  %v1335_v56 = vld [vmem:[%s1761_s3 + $0x38] sm:$0xff]   ;;  %v1337_v58 = vld [vmem:[%s1761_s3 + $0x30] sm:$0xff]   ;;  %v1339_v60 = vld [vmem:[%s1761_s3 + $0x28] sm:$0xff]  }
  0x24   : > { %v1340_v61 = vld [vmem:[%s1761_s3 + $0x60] sm:$0xff]   ;;  %v1342_v63 = vld [vmem:[%s1761_s3 + $0x58] sm:$0xff]   ;;  %v1346_v23 = vld [vmem:[%s1761_s3 + $0x48] sm:$0xff]  }
  0x25   : > { %v1341_v62 = vld [vmem:[%s1761_s3 + $0x20] sm:$0xff]   ;;  %v1343_v0 = vld [vmem:[%s1761_s3 + $0x18] sm:$0xff]   ;;  %v1347_v24 = vld [vmem:[%s1761_s3 + $0x8] sm:$0xff]  }
  0x26   : > { %333 = vmatpush1.bf16.msra.mxu0 %v1279_v17  ;;  %588 = vmatpush1.bf16.msra.mxu1 %v1300_v28  ;;  %v1349_v26 = vld [vmem:[%s1761_s3] sm:$0xff]  }
  0x27   : > { %334 = vmatprep.subr.bf16.mxu0 %v1280_v18  ;;  %589 = vmatprep.subr.bf16.mxu1 %v1301_v29 }
  0x2a   : > { %335 = vmatpush1.bf16.msra.mxu0 %v1282_v21  ;;  %590 = vmatpush1.bf16.msra.mxu1 %v1303_v30  ;;  %v1344_v21 = vld [vmem:[%s1761_s3 + $0x50] sm:$0xff]  }
  0x2b   : > { %336 = vmatprep.subr.bf16.mxu0 %v1283_v22  ;;  %591 = vmatprep.subr.bf16.mxu1 %v1304_v32  ;;  %v1345_v22 = vld [vmem:[%s1761_s3 + $0x10] sm:$0xff]  }
  0x2e   : > { %337 = vmatpush1.bf16.msra.mxu0 %v1285_v25  ;;  %592 = vmatpush1.bf16.msra.mxu1 %v1306_v35  ;;  %v1348_v25 = vld [vmem:[%s1761_s3 + $0x40] sm:$0xff]  }
  0x2f   : > { %593 = vmatprep.subr.bf16.mxu1 %v1307_v36  ;;  %1145 = vmatprep.subr.bf16.mxu0 %v1334_v55 }
  0x31   : > { %355 = vmatmul.mubr.bf16.vlgmr.msra.gmra.mxu0 %v224_v31 }
  0x32   : > { %364 = vmatprep.mubr.bf16.mxu0 %v1438_v2  ;;  %594 = vmatpush1.bf16.msra.mxu1 %v1309_v37 }
  0x33   : > { %595 = vmatprep.subr.bf16.mxu1 %v1310_v39  ;;  %1146 = vmatpush3.bf16.msra.mxu0 %v1335_v56 }
  0x34   : > { %1147 = vmatprep.subr.bf16.mxu0 %v1336_v57 }
  0x36   : > { %596 = vmatpush2.bf16.msra.mxu1 %v1312_v40 }
  0x37   : > { %597 = vmatprep.subr.bf16.mxu1 %v1313_v41  ;;  %1148 = vmatpush3.bf16.msra.mxu0 %v1337_v58 }
  0x38   : > { %1149 = vmatprep.subr.bf16.mxu0 %v1338_v59 }
  0x39   : > { %365 = vmatmul.mubr.bf16.gmra.mxu0 %v225_v38 }
  0x3a   : > { %598 = vmatpush2.bf16.msra.mxu1 %v1315_v42 }
  0x3b   : > { %599 = vmatprep.subr.bf16.mxu1 %v1316_v43  ;;  %1150 = vmatpush3.bf16.msra.mxu0 %v1339_v60 }
  0x3c   : > { %1151 = vmatprep.subr.bf16.mxu0 %v1340_v61 }
  0x3e   : > { %600 = vmatpush2.bf16.msra.mxu1 %v1318_v44 }
  0x3f   : > { %601 = vmatprep.subr.bf16.mxu1 %v1319_v45  ;;  %1152 = vmatpush3.bf16.msra.mxu0 %v1341_v62 }
  0x40   : > { %1153 = vmatprep.subr.bf16.mxu0 %v1342_v63 }
  0x42   : > { %602 = vmatpush2.bf16.msra.mxu1 %v1321_v46 }
  0x43   : > { %603 = vmatprep.subr.bf16.mxu1 %v1322_v47  ;;  %1154 = vmatpush3.bf16.msra.mxu0 %v1343_v0 }
  0x44   : > { %1155 = vmatprep.subr.bf16.mxu0 %v1344_v21 }
  0x46   : > { %604 = vmatpush2.bf16.msra.mxu1 %v1324_v48 }
  0x47   : > { %605 = vmatprep.subr.bf16.mxu1 %v1325_v49  ;;  %1156 = vmatpush3.bf16.msra.mxu0 %v1345_v22 }
  0x48   : > { %1157 = vmatprep.subr.bf16.mxu0 %v1346_v23 }
  0x4a   : > { %606 = vmatpush2.bf16.msra.mxu1 %v1327_v50 }
  0x4b   : > { %607 = vmatprep.subr.bf16.mxu1 %v1328_v51  ;;  %1158 = vmatpush3.bf16.msra.mxu0 %v1347_v24 }
  0x4c   : > { %1159 = vmatprep.subr.bf16.mxu0 %v1348_v25 }
  0x4e   : > { %608 = vmatpush2.bf16.msra.mxu1 %v1330_v52 }
  0x4f   : > { %609 = vmatprep.subr.bf16.mxu1 %v1331_v53  ;;  %1160 = vmatpush3.bf16.msra.mxu0 %v1349_v26 }
  0x52   : > { %610 = vmatpush2.bf16.msra.mxu1 %v1333_v54 }
  0xf1   : > { %v356_v1 = vpop.f32.mrf.mxu0 }
  0xf2   : > { %v375_v8 = vmax.f32 %v356_v1, 0.0 }
  0xf3   : > { %v358_v2 = vpop.f32.mrf.mxu0 }
  0xf4   : > { %v376_v6 = vmax.f32 %v358_v2, 0.0 }
  0xf5   : > { %v360_v3 = vpop.f32.mrf.mxu0 }
  0xf6   : > { %v377_v4 = vmax.f32 %v360_v3, 0.0 }
  0xf7   : > { %v362_v5 = vpop.f32.mrf.mxu0 }
  0xf8   : > { %v378_v7 = vmax.f32 %v362_v5, 0.0  ;;  %v383_v11 = vpack.c.bf16 %v377_v4, %v375_v8 }
  0xf9   : > { %v366_v9 = vpop.f32.mrf.mxu0 }
  0xfa   : > { %v384_v10 = vpack.c.bf16 %v378_v7, %v376_v6  ;;  %v379_v18 = vmax.f32 %v366_v9, 0.0 }
  0xfb   : > { %v368_v12 = vpop.f32.mrf.mxu0 }
  0xfc   : > { %611 = vmatprep.mubr.bf16.mxu1 %v384_v10  ;;  %v380_v16 = vmax.f32 %v368_v12, 0.0 }
  0xfd   : > { %v370_v13 = vpop.f32.mrf.mxu0  ;;  %612 = vmatmul.mubr.bf16.vlgmr.msra.gmra.mxu1 %v383_v11 }
  0xfe   : > { %v381_v14 = vmax.f32 %v370_v13, 0.0 }
  0xff   : > { %v372_v15 = vpop.f32.mrf.mxu0 }
 0x100   : > { %v382_v17 = vmax.f32 %v372_v15, 0.0  ;;  %v385_v20 = vpack.c.bf16 %v381_v14, %v379_v18 }
 0x102   : > { %v386_v19 = vpack.c.bf16 %v382_v17, %v380_v16 }
 0x104   : > { %621 = vmatprep.mubr.bf16.mxu1 %v386_v19 }
 0x105   : > { %622 = vmatmul.mubr.bf16.gmra.mxu1 %v385_v20 }
 0x1bd   : > { %v613_v27 = vpop.f32.mrf.mxu1 }
 0x1be   : > { %v632_v34 = vmax.f32 %v613_v27, 0.0 }
 0x1bf   : > { %v615_v28 = vpop.f32.mrf.mxu1 }
 0x1c0   : > { %v633_v32 = vmax.f32 %v615_v28, 0.0 }
 0x1c1   : > { %v617_v29 = vpop.f32.mrf.mxu1 }
 0x1c2   : > { %v634_v30 = vmax.f32 %v617_v29, 0.0 }
 0x1c3   : > { %v619_v31 = vpop.f32.mrf.mxu1 }
 0x1c4   : > { %v635_v33 = vmax.f32 %v619_v31, 0.0  ;;  %v640_v37 = vpack.c.bf16 %v634_v30, %v632_v34 }
 0x1c5   : > { %v623_v35 = vpop.f32.mrf.mxu1 }
 0x1c6   : > { %v641_v36 = vpack.c.bf16 %v635_v33, %v633_v32  ;;  %v636_v44 = vmax.f32 %v623_v35, 0.0 }
 0x1c7   : > { %v625_v38 = vpop.f32.mrf.mxu1 }
 0x1c8   : > { %804 = vmatprep.mubr.bf16.mxu0 %v641_v36  ;;  %v637_v42 = vmax.f32 %v625_v38, 0.0 }
 0x1c9   : > { %v627_v39 = vpop.f32.mrf.mxu1  ;;  %805 = vmatmul.mubr.bf16.vlgmr.msra.gmra.mxu0 %v640_v37 }
 0x1ca   : > { %v638_v40 = vmax.f32 %v627_v39, 0.0 }
 0x1cb   : > { %v629_v41 = vpop.f32.mrf.mxu1 }
 0x1cc   : > { %v639_v43 = vmax.f32 %v629_v41, 0.0  ;;  %v642_v46 = vpack.c.bf16 %v638_v40, %v636_v44 }
 0x1ce   : > { %v643_v45 = vpack.c.bf16 %v639_v43, %v637_v42 }
 0x1d0   : > { %812 = vmatprep.mubr.bf16.mxu0 %v643_v45 }
 0x1d1   : > { %813 = vmatmul.mubr.bf16.gmra.mxu0 %v642_v46 }
 0x289   : > { %v1161_v47 = vpop.f32.mrf.mxu0 }
 0x28b   : > { %v1162_v48 = vpop.f32.mrf.mxu0 }
 0x28c   : > { %v1163_v49 = vadd.f32 %v1162_v48, %v1161_v47 }
 0x28d   : > { %v1164_v50 = vpop.f32.mrf.mxu0 }
 0x28e   : > { %822 = vst.msk [vmem:[%s1696_s26] sm:$0xff] %vm821_vm0, %v1163_v49 }
 0x28f   : > { %v1165_v51 = vpop.f32.mrf.mxu0 }
 0x290   : > { %v1166_v52 = vadd.f32 %v1165_v51, %v1164_v50 }
 0x291   : > { %v1167_v53 = vpop.f32.mrf.mxu0 }
 0x292   : > { %823 = vst.msk [vmem:[%s1696_s26 + $0x8] sm:$0xff] %vm821_vm0, %v1166_v52 }
 0x293   : > { %v1168_v54 = vpop.f32.mrf.mxu0 }
 0x294   : > { %v1169_v55 = vadd.f32 %v1168_v54, %v1167_v53 }
 0x295   : > { %v1170_v56 = vpop.f32.mrf.mxu0 }
 0x296   : > { %824 = vst.msk [vmem:[%s1696_s26 + $0x10] sm:$0xff] %vm821_vm0, %v1169_v55  ;;  %832 = sbr.rel (!%p1489_p4) target bundleno = 706 (0x2c2), region = 40 }
 0x297   : > { %v1171_v57 = vpop.f32.mrf.mxu0 }
 0x298   : > { %v1172_v58 = vadd.f32 %v1171_v57, %v1170_v56 }
 0x29a   : > { %825 = vst.msk [vmem:[%s1696_s26 + $0x18] sm:$0xff] %vm821_vm0, %v1172_v58 }
 0x29b   : > { %s1771_s15 = smov (!%p835_p8, %s834_s15), 4 }
 0x29c   : > { %s1127_s5 = sshll.u32 %s1771_s15, 7 }
 0x29d   : > { %p1130_p9 = scmp.eq.s32.totalorder %s1127_s5, 0 }
 0x29e   : > { %s1715_s6 = sshrl.u32 (!%p1130_p9), %s1771_s15, 2 }
 0x29f   : > { %843 = sbr.rel (%p1130_p9) target bundleno = 706 (0x2c2), region = 44  ;;  %p1131_p10 = scmp.le.s32.totalorder (!%p1130_p9), %s1715_s6, 0 }
 0x2a4   : > { %1010 = sbr.rel (%p1131_p10) target bundleno = 689 (0x2b1), region = 120  ;;  %s1764_s18 = smov (!%p1131_p10), %s1709_s30 }
 0x2a5   : > { %s1765_s23 = smov (!%p1131_p10), %s1696_s26  ;;  %s1724_s12 = smov (!%p1131_p10), 0  }
 0x2a6   : > { %s1418_s7 = smov (!%p1131_p10), 0  }
 0x2a9 LB: >> { %v912_v59 = vld [vmem:[%s1412_s23] sm:$0xff]  ;;  %v914_v60 = vld [vmem:[%s1412_s23 + $0x8] sm:$0xff]  ;;  %v916_v61 = vld [vmem:[%s1412_s23 + $0x10] sm:$0xff]  ;;  %s920_s9 = sadd.s32 1, %s1416_s12  ;;  %s906_s7 = sadd.s32 1, %s1420_s7   ;;  %s1420_s7 = sphi %s1418_s7, %s906_s7   ;;  %s1416_s12 = sphi %s1724_s12, %s1766_s12   ;;  %s1412_s23 = sphi %s1765_s23, %s925_s23   ;;  %s1408_s18 = sphi %s1764_s18, %s926_s18  }
 0x2aa   : >> { %913 = vst [vmem:[%s1408_s18] sm:$0xff] %v912_v59  ;;  %915 = vst [vmem:[%s1408_s18 + $0x8] sm:$0xff] %v914_v60  ;;  %v918_v62 = vld [vmem:[%s1412_s23 + $0x18] sm:$0xff]  ;;  %p921_p11 = scmp.ge.s32.totalorder %s920_s9, %s1715_s6  ;;  %p905_p12 = scmp.ge.s32.totalorder %s906_s7, %s1715_s6 }
 0x2ab   : >> { %917 = vst [vmem:[%s1408_s18 + $0x10] sm:$0xff] %v916_v61  ;;  %919 = vst [vmem:[%s1408_s18 + $0x18] sm:$0xff] %v918_v62 }
 0x2ac   : >> { %s1773_s9 = smov (%p921_p11, %s920_s9), 0  ;;  %908 = sbr.rel (!%p905_p12) target bundleno = 681 (0x2a9), region = 126 }
 0x2ad   : >> { %s1132_s10 = sshll.u32 %s1773_s9, 5  ;;  %s1766_s12 = smov %s1773_s9 }
 0x2ae   : >> { %s925_s23 = scalar_lea.vmem %s1696_s26, %s1132_s10 [#allocation2]   ;;  %s926_s18 = scalar_lea.vmem %s1709_s30, %s1132_s10  }
 0x2b1 PF: > { %s1740_s11 = sand.u32 3, %s1771_s15   ;;  %s1143_s8 = sshll.u32 %s1715_s6, 5 }
 0x2b2   : > { %s931_s13 = scalar_lea.vmem %s1696_s26, %s1143_s8 [#allocation2]   ;;  %s933_s14 = scalar_lea.vmem %s1709_s30, %s1143_s8  }
 0x2b3   : > { %p1137_p13 = scmp.le.s32.totalorder %s1740_s11, 0 }
 0x2b4   : > { %s1422_s17 = smov (!%p1137_p13), %s933_s14   ;;  %s1426_s20 = smov (!%p1137_p13), %s931_s13  }
 0x2b5   : > { %1024 = sbr.rel (%p1137_p13) target bundleno = 706 (0x2c2), region = 131  ;;  %s1430_s21 = smov (!%p1137_p13), 0  }
 0x2b6   : > { %s1434_s24 = smov (!%p1137_p13), 0  }
 0x2ba LB: >> { %v943_v63 = vld [vmem:[%s1428_s20] sm:$0xff]  ;;  %s945_s25 = sadd.s32 1, %s1432_s21  ;;  %s937_s24 = sadd.s32 1, %s1436_s24   ;;  %s1436_s24 = sphi %s1434_s24, %s937_s24   ;;  %s1432_s21 = sphi %s1430_s21, %s1431_s21   ;;  %s1428_s20 = sphi %s1426_s20, %s950_s20   ;;  %s1424_s17 = sphi %s1422_s17, %s951_s17  }
 0x2bb   : >> { %944 = vst [vmem:[%s1424_s17] sm:$0xff] %v943_v63  ;;  %p946_p0 = scmp.ge.s32.totalorder %s945_s25, %s1740_s11  ;;  %p936_p1 = scmp.ge.s32.totalorder %s937_s24, %s1740_s11 }
 0x2bd   : >> { %s1775_s25 = smov (%p946_p0, %s945_s25), 0  ;;  %939 = sbr.rel (!%p936_p1) target bundleno = 698 (0x2ba), region = 137 }
 0x2be   : >> { %s1138_s26 = sshll.u32 %s1775_s25, 3  ;;  %s1431_s21 = smov %s1775_s25  }
 0x2bf   : >> { %s950_s20 = scalar_lea.vmem %s931_s13, %s1138_s26 [#allocation2]   ;;  %s951_s17 = scalar_lea.vmem %s933_s14, %s1138_s26  }
 0x2c2 PF: > { %p11_p2 = scmp.ge.s32.totalorder %s1479_s19, 4   ;;  %s1767_s15 = smov %s1400_s16 }
 0x2c3   : > { %s1768_s16 = smov %s1487_s22  ;;  %s1769_s17 = smov %s1479_s19 }
 0x2c4   :  { %13 = sbr.rel (!%p11_p2) target bundleno = 2 (0x2), region = 148 }

</bundles_post_ra>
